<compile_context>
chip_gen: v6e
topology: v6e:2x2x1
jax: 0.10.0
libtpu: 0.0.40
codegen_flags: <defaults>
</compile_context>

<pallas_src>
import math

import numpy as np
import jax
import jax.numpy as jnp
from jax import lax
from jax.experimental import pallas as pl
from jax.experimental.pallas import tpu as pltpu

# ---------------- small shapes consistent with the module --------------------
B = 2      # batch size
S = 8      # seq_length == graph size (solutions are permutations of range(S))
ND = 4     # node_dim
E = 32     # embedding_dim


# ---------------- sinusoid table (exactly mirrors position_encoding_init) ----
def position_encoding_init(n_position, emb_dim):
    position_enc = np.array(
        [[pos / np.power(10000, 2 * (j // 2) / emb_dim) for j in range(emb_dim)]
         for pos in range(1, n_position + 1)])
    position_enc[1:, 0::2] = np.sin(position_enc[1:, 0::2])
    position_enc[1:, 1::2] = np.cos(position_enc[1:, 1::2])
    return jnp.asarray(position_enc, dtype=jnp.float32)          # (S, E)


# ---------------- Pallas kernel ----------------------------------------------
def embedding_net_kernel(x_ref, w_ref, enc_ref, sols_ref,
                         emb_ref, pos_ref, best_ref):
    # ---- embedder: y = x @ W.T + b  (bias folded as the last row of w_ref,
    #      matching the ones column appended to x). Batch folded into rows. ----
    x2 = x_ref[...].reshape(B * S, ND + 1)                        # (B*S, ND+1)
    emb = jnp.dot(x2, w_ref[...], preferred_element_type=jnp.float32)
    emb_ref[...] = emb.reshape(B, S, E)

    # ---- positional-encoding gathers as ONE one-hot matmul ----
    # onehot[g, i, t] = (sols[g, t] == i): row i selects the enc row at the
    # position where node i is visited.  Equivalent to the torch.nonzero /
    # gather construction, which (like this) assumes each row of
    # solutions / best_solutions is a permutation of range(S).
    sols = sols_ref[...]                                          # (2B, S) int32
    node_id = lax.broadcasted_iota(jnp.int32, (2 * B, S, S), 1)   # i along dim 1
    onehot = (sols[:, None, :] == node_id).astype(jnp.float32)    # (2B, S, S)
    pe = jnp.dot(onehot.reshape(2 * B * S, S), enc_ref[...],
                 preferred_element_type=jnp.float32)              # (2B*S, E)
    pe = pe.reshape(2 * B, S, E)
    pos_ref[...] = pe[:B]                                         # from solutions
    best_ref[...] = pe[B:]                                        # from best_solutions


# ---------------- wrapper -----------------------------------------------------
def embedding_net(x, W, bvec, enc, solutions, best_solutions):
    """x: (B,S,ND) f32; W: (E,ND) torch-Linear weight; bvec: (E,);
    enc: (S,E) f32; solutions/best_solutions: (B,S) int32 permutations."""
    ones = jnp.ones((B, S, 1), jnp.float32)
    x_aug = jnp.concatenate([x, ones], axis=-1)                   # (B, S, ND+1)
    w_aug = jnp.concatenate([W.T, bvec[None, :]], axis=0)         # (ND+1, E)
    sols = jnp.concatenate([solutions, best_solutions], axis=0)   # (2B, S)
    sols = sols.astype(jnp.int32)

    c2 = lambda i: (0, 0)
    c3 = lambda i: (0, 0, 0)
    out_sd = jax.ShapeDtypeStruct((B, S, E), jnp.float32)

    return pl.pallas_call(
        embedding_net_kernel,
        out_shape=(out_sd, out_sd, out_sd),
        grid_spec=pltpu.PrefetchScalarGridSpec(
            num_scalar_prefetch=0,
            grid=(1,),                                            # single step
            in_specs=[
                pl.BlockSpec((B, S, ND + 1), c3),                 # x (+ ones col)
                pl.BlockSpec((ND + 1, E), c2),                    # W.T (+ bias row)
                pl.BlockSpec((S, E), c2),                         # enc table
                pl.BlockSpec((2 * B, S), c2),                     # stacked solutions
            ],
            out_specs=[pl.BlockSpec((B, S, E), c3) for _ in range(3)],
        ),
        compiler_params=pltpu.CompilerParams(
            dimension_semantics=("arbitrary",)),
    )(x_aug, w_aug, enc, sols)


# ---------------- pure-JAX reference (mirrors the PyTorch forward) ------------
def reference(x, W, bvec, enc, solutions, best_solutions):
    hp = jax.lax.Precision.HIGHEST
    emb = jnp.einsum('bsn,en->bse', x, W, precision=hp) + bvec
    # visited_time[b, i] = position of node i in solutions[b] (permutation).
    vt = jnp.argsort(solutions, axis=1)
    bvt = jnp.argsort(best_solutions, axis=1)
    return emb, enc[vt], enc[bvt]


if __name__ == "__main__":
    key = jax.random.PRNGKey(0)
    ks = jax.random.split(key, 6)

    x = jax.random.normal(ks[0], (B, S, ND), jnp.float32)

    # nn.Linear(node_dim, embedding_dim): weight (E, ND), bias (E,)
    stdv = 1.0 / math.sqrt(ND)
    W = jax.random.uniform(ks[1], (E, ND), jnp.float32, -stdv, stdv)
    bvec = jax.random.uniform(ks[2], (E,), jnp.float32, -stdv, stdv)

    solutions = jnp.stack(
        [jax.random.permutation(k, S) for k in jax.random.split(ks[3], B)]
    ).astype(jnp.int32)
    best_solutions = jnp.stack(
        [jax.random.permutation(k, S) for k in jax.random.split(ks[4], B)]
    ).astype(jnp.int32)

    enc = position_encoding_init(S, E)                            # (S, E)

    emb, pos_enc, best_pos_enc = embedding_net(
        x, W, bvec, enc, solutions, best_solutions)
    jax.block_until_ready((emb, pos_enc, best_pos_enc))

    emb_r, pos_r, best_r = reference(x, W, bvec, enc, solutions, best_solutions)

    assert emb.shape == (B, S, E)
    assert pos_enc.shape == (B, S, E)
    assert best_pos_enc.shape == (B, S, E)
    assert jnp.allclose(emb, emb_r, atol=1e-4, rtol=1e-4), "embedder mismatch"
    assert jnp.allclose(pos_enc, pos_r, atol=1e-4, rtol=1e-4), "pos_enc mismatch"
    assert jnp.allclose(best_pos_enc, best_r, atol=1e-4, rtol=1e-4), \
        "best_pos_enc mismatch"

    print("KERNEL_OK")
</pallas_src>

<mosaic_0001>
module attributes {stable_mosaic.version = 11 : i64} {
  func.func @embedding_net_kernel(%arg0: i32, %arg1: memref<2x8x5xf32, #tpu.memory_space<vmem>>, %arg2: memref<5x32xf32, #tpu.memory_space<vmem>>, %arg3: memref<8x32xf32, #tpu.memory_space<vmem>>, %arg4: memref<4x8xi32, #tpu.memory_space<vmem>>, %arg5: memref<2x8x32xf32, #tpu.memory_space<vmem>>, %arg6: memref<2x8x32xf32, #tpu.memory_space<vmem>>, %arg7: memref<2x8x32xf32, #tpu.memory_space<vmem>>) attributes {dimension_semantics = [#tpu.dimension_semantics<arbitrary>], iteration_bounds = array<i64: 1>, scalar_prefetch = 0 : i64, scratch_operands = 0 : i64, tpu.core_type = #tpu.core_type<tc>, window_params = [{pipeline_mode = #tpu.pipeline_mode<synchronous>, transform_indices = @transform_0, window_bounds = array<i64: 2, 8, 5>}, {pipeline_mode = #tpu.pipeline_mode<synchronous>, transform_indices = @transform_1, window_bounds = array<i64: 5, 32>}, {pipeline_mode = #tpu.pipeline_mode<synchronous>, transform_indices = @transform_2, window_bounds = array<i64: 8, 32>}, {pipeline_mode = #tpu.pipeline_mode<synchronous>, transform_indices = @transform_3, window_bounds = array<i64: 4, 8>}, {pipeline_mode = #tpu.pipeline_mode<synchronous>, transform_indices = @transform_4, window_bounds = array<i64: 2, 8, 32>}, {pipeline_mode = #tpu.pipeline_mode<synchronous>, transform_indices = @transform_5, window_bounds = array<i64: 2, 8, 32>}, {pipeline_mode = #tpu.pipeline_mode<synchronous>, transform_indices = @transform_6, window_bounds = array<i64: 2, 8, 32>}]} {
    %c0 = arith.constant 0 : index
    %c0_0 = arith.constant 0 : index
    %c0_1 = arith.constant 0 : index
    %0 = vector.load %arg1[%c0, %c0_0, %c0_1] : memref<2x8x5xf32, #tpu.memory_space<vmem>>, vector<2x8x5xf32>
    %1 = vector.shape_cast %0 : vector<2x8x5xf32> to vector<16x5xf32>
    %c0_2 = arith.constant 0 : index
    %c0_3 = arith.constant 0 : index
    %2 = vector.load %arg2[%c0_2, %c0_3] : memref<5x32xf32, #tpu.memory_space<vmem>>, vector<5x32xf32>
    %cst = arith.constant dense<0.000000e+00> : vector<16x32xf32>
    %3 = tpu.matmul %1, %2, %cst {dimension_numbers = #tpu.dot_dimension_numbers<[1], [0], [0], [1], [0, 0, 1, 1], [], []>} : vector<16x5xf32>, vector<5x32xf32>, vector<16x32xf32> -> vector<16x32xf32>
    %4 = vector.shape_cast %3 : vector<16x32xf32> to vector<2x8x32xf32>
    %c0_4 = arith.constant 0 : index
    %c0_5 = arith.constant 0 : index
    %c0_6 = arith.constant 0 : index
    %5 = vector.load %arg5[%c0_4, %c0_5, %c0_6] : memref<2x8x32xf32, #tpu.memory_space<vmem>>, vector<2x8x32xf32>
    tpu.vector_store %arg5[%c0_4, %c0_5, %c0_6], %4 {strides = array<i32>} : memref<2x8x32xf32, #tpu.memory_space<vmem>>, vector<2x8x32xf32>,
    %c0_7 = arith.constant 0 : index
    %c0_8 = arith.constant 0 : index
    %6 = vector.load %arg4[%c0_7, %c0_8] : memref<4x8xi32, #tpu.memory_space<vmem>>, vector<4x8xi32>
    %7 = tpu.iota {dimensions = array<i32: 1>} : vector<4x8x8xi32>
    %8 = vector.shape_cast %6 : vector<4x8xi32> to vector<4x1x8xi32>
    %9 = vector.broadcast %8 : vector<4x1x8xi32> to vector<4x8x8xi32>
    %10 = arith.cmpi eq, %9, %7 : vector<4x8x8xi32>
    %11 = arith.extui %10 : vector<4x8x8xi1> to vector<4x8x8xi32>
    %12 = arith.sitofp %11 : vector<4x8x8xi32> to vector<4x8x8xf32>
    %13 = vector.shape_cast %12 : vector<4x8x8xf32> to vector<32x8xf32>
    %c0_9 = arith.constant 0 : index
    %c0_10 = arith.constant 0 : index
    %14 = vector.load %arg3[%c0_9, %c0_10] : memref<8x32xf32, #tpu.memory_space<vmem>>, vector<8x32xf32>
    %cst_11 = arith.constant dense<0.000000e+00> : vector<32x32xf32>
    %15 = tpu.matmul %13, %14, %cst_11 {dimension_numbers = #tpu.dot_dimension_numbers<[1], [0], [0], [1], [0, 0, 1, 1], [], []>} : vector<32x8xf32>, vector<8x32xf32>, vector<32x32xf32> -> vector<32x32xf32>
    %16 = vector.shape_cast %15 : vector<32x32xf32> to vector<4x8x32xf32>
    %17 = vector.extract_strided_slice %16 {offsets = [0, 0, 0], sizes = [2, 8, 32], strides = [1, 1, 1]} : vector<4x8x32xf32> to vector<2x8x32xf32>
    %c0_12 = arith.constant 0 : index
    %c0_13 = arith.constant 0 : index
    %c0_14 = arith.constant 0 : index
    %18 = vector.load %arg6[%c0_12, %c0_13, %c0_14] : memref<2x8x32xf32, #tpu.memory_space<vmem>>, vector<2x8x32xf32>
    tpu.vector_store %arg6[%c0_12, %c0_13, %c0_14], %17 {strides = array<i32>} : memref<2x8x32xf32, #tpu.memory_space<vmem>>, vector<2x8x32xf32>,
    %19 = vector.extract_strided_slice %16 {offsets = [2, 0, 0], sizes = [2, 8, 32], strides = [1, 1, 1]} : vector<4x8x32xf32> to vector<2x8x32xf32>
    %c0_15 = arith.constant 0 : index
    %c0_16 = arith.constant 0 : index
    %c0_17 = arith.constant 0 : index
    %20 = vector.load %arg7[%c0_15, %c0_16, %c0_17] : memref<2x8x32xf32, #tpu.memory_space<vmem>>, vector<2x8x32xf32>
    tpu.vector_store %arg7[%c0_15, %c0_16, %c0_17], %19 {strides = array<i32>} : memref<2x8x32xf32, #tpu.memory_space<vmem>>, vector<2x8x32xf32>,
    return
  }
  func.func @transform_0(%arg0: i32) -> (i32, i32, i32) {
    %c0_i32 = arith.constant 0 : i32
    %c0_i32_0 = arith.constant 0 : i32
    %c0_i32_1 = arith.constant 0 : i32
    %c0_i32_2 = arith.constant 0 : i32
    return %c0_i32, %c0_i32_0, %c0_i32_1 : i32, i32, i32
  }
  func.func @transform_1(%arg0: i32) -> (i32, i32) {
    %c0_i32 = arith.constant 0 : i32
    %c0_i32_0 = arith.constant 0 : i32
    %c0_i32_1 = arith.constant 0 : i32
    return %c0_i32, %c0_i32_0 : i32, i32
  }
  func.func @transform_2(%arg0: i32) -> (i32, i32) {
    %c0_i32 = arith.constant 0 : i32
    %c0_i32_0 = arith.constant 0 : i32
    %c0_i32_1 = arith.constant 0 : i32
    return %c0_i32, %c0_i32_0 : i32, i32
  }
  func.func @transform_3(%arg0: i32) -> (i32, i32) {
    %c0_i32 = arith.constant 0 : i32
    %c0_i32_0 = arith.constant 0 : i32
    %c0_i32_1 = arith.constant 0 : i32
    return %c0_i32, %c0_i32_0 : i32, i32
  }
  func.func @transform_4(%arg0: i32) -> (i32, i32, i32) {
    %c0_i32 = arith.constant 0 : i32
    %c0_i32_0 = arith.constant 0 : i32
    %c0_i32_1 = arith.constant 0 : i32
    %c0_i32_2 = arith.constant 0 : i32
    return %c0_i32, %c0_i32_0, %c0_i32_1 : i32, i32, i32
  }
  func.func @transform_5(%arg0: i32) -> (i32, i32, i32) {
    %c0_i32 = arith.constant 0 : i32
    %c0_i32_0 = arith.constant 0 : i32
    %c0_i32_1 = arith.constant 0 : i32
    %c0_i32_2 = arith.constant 0 : i32
    return %c0_i32, %c0_i32_0, %c0_i32_1 : i32, i32, i32
  }
  func.func @transform_6(%arg0: i32) -> (i32, i32, i32) {
    %c0_i32 = arith.constant 0 : i32
    %c0_i32_0 = arith.constant 0 : i32
    %c0_i32_1 = arith.constant 0 : i32
    %c0_i32_2 = arith.constant 0 : i32
    return %c0_i32, %c0_i32_0, %c0_i32_1 : i32, i32, i32
  }
}

</mosaic_0001>

<bundles_post_ra>
// kernel: tpu_custom_call.1
= control target key start
LH: loop header
LB: loop body
LE: loop exit
PB: predicated region body
PF: predicated region fallthrough
CT: control target
= control target key end

     0   :  { %12 = vsyncpa [#allocation3], 0  ;;  %v115_v2 = vlaneseq  ;;  %vm32_vm0 = vcmask 1044480   ;;  %v423_v5 = vmov 1966171168   ;;  %vm25_vm1 = vcmask 39936   ;;  %s504_s0 = inlined_call_operand.vmem [shape: f32[2,8,5], index: 0, kind: input, shape index: {}]   ;;  %s505_s1 = inlined_call_operand.vmem [shape: f32[5,32], index: 1, kind: input, shape index: {}]   ;;  %s506_s2 = inlined_call_operand.vmem [shape: f32[8,32], index: 2, kind: input, shape index: {}]   ;;  %s507_s3 = inlined_call_operand.vmem [shape: s32[4,8], index: 3, kind: input, shape index: {}]   ;;  %s508_s4 = inlined_call_operand.hbm [shape: f32[2,8,32], index: 4, kind: output, shape index: {0}]   ;;  %s509_s5 = inlined_call_operand.hbm [shape: f32[2,8,32], index: 5, kind: output, shape index: {1}]   ;;  %s510_s6 = inlined_call_operand.hbm [shape: f32[2,8,32], index: 6, kind: output, shape index: {2}]  }
   0x1   :  { %v169_v0 = vld [vmem:[%s506_s2] sm:$0xff]  ;;  %v126_v6 = vunpack.c.l.s4 %v423_v5  ;;  %v23_v8 = vld [vmem:[%s504_s0 + $0x8] sm:$0xff] }
   0x2   :  { %v322_v1 = vld.sshfl [vmem:[%s507_s3] sm:$0x33 pattern:$0x75316420]  ;;  %344 = vmatprep.subr.mxu1 %v169_v0  ;;  %v116_v4 = vshrl.u32 %v115_v2, 7 }
   0x3   :  { %v24_v3 = vld [vmem:[%s505_s1] sm:$0x1f]  ;;  %345 = vmatpush3.msra.mxu1 %v169_v0 }
   0x4   :  { %339 = vmatprep.subr.msk.mxu0 %vm32_vm0, %v24_v3  ;;  %v22_v7 = vld [vmem:[%s504_s0] sm:$0xff] }
   0x5   :  { %340 = vmatpush3.msk.msra.mxu0 %vm32_vm0, %v24_v3  ;;  %341 = vmatprep.mubr.msk.f32.mxu0 %vm25_vm1, %v22_v7 }
   0x6   :  { %13 = vsyncpa [#allocation5], 0  ;;  %v124_v9 = vcombine.high %v322_v1, %v322_v1  ;;  %v127_v10 = vunpack.c.0.s8 %v126_v6  ;;  %342 = vmatmul.mubr.msk.f32.vlgmr.msra.gmra.mxu0 %vm25_vm1, %v23_v8  ;;  %v143_v12 = vsub.s32 0, %v116_v4  ;;  %vm170_vm2 = vcmask 64512   ;;  %s425_s0 = smov [#allocation2]  }
   0x7   :  { %v424_v21 = vmov 0.0   ;;  %s277_s1 = sshll.u32 %s425_s0, 4  ;;  %vm111_vm7 = vcmask 261120   ;;  %s278_s1 = int_to_ptr.vmem [resolvable:$true] %s277_s1 }
   0x8   :  { %v130_v11 = vsub.s32 %v127_v10, %v116_v4  ;;  %s359_s3 = scalar_lea.vmem %s278_s1, 256  ;;  %p364_p1 = scmp.lt.s32.totalorder %s278_s1, %s278_s1 }
   0x9   :  { %p360_p0 = scmp.ne.s32.totalorder %s278_s1, %s359_s3  ;;  %p365_p2 = scmp.lt.s32.totalorder %s359_s3, %s359_s3 }
   0xa   :  { %v131_v13 = vrot.slane %v322_v1, %v130_v11  ;;  %v138_v14 = vrot.slane %v124_v9, %v130_v11 }
   0xb   :  { %p366_p3 = por %p365_p2, %p364_p1 }
   0xc   :  { %v139_v15 = vcombine.high %v131_v13, %v131_v13  ;;  %v144_v16 = vrot.slane %v131_v13, %v143_v12  ;;  %v148_v17 = vrot.slane %v138_v14, %v143_v12  ;;  %v140_v18 = vcombine.high %v138_v14, %v138_v14 }
   0xd   :  { %p367_p4 = pnand %p366_p3, %p360_p0 }
   0xe   :  { %vm157_vm3 = vcmp.eq.s32.totalorder %v144_v16, %v116_v4  ;;  %vm158_vm4 = vcmp.eq.s32.totalorder %v148_v17, %v116_v4  ;;  %v152_v19 = vrot.slane %v139_v15, %v143_v12  ;;  %v156_v20 = vrot.slane %v140_v18, %v143_v12 }
   0xf   :  { %v323_v22 = vsel %vm157_vm3, 1.0, %v424_v21  ;;  %v324_v23 = vsel %vm158_vm4, 1.0, %v424_v21 }
  0x10   :  { %346 = vmatprep.mubr.msk.f32.mxu1 %vm170_vm2, %v323_v22  ;;  %vm159_vm5 = vcmp.eq.s32.totalorder %v152_v19, %v116_v4  ;;  %vm160_vm6 = vcmp.eq.s32.totalorder %v156_v20, %v116_v4 }
  0x11   :  { %347 = vmatmul.mubr.msk.f32.vlgmr.msra.gmra.mxu1 %vm170_vm2, %v324_v23  ;;  %v325_v24 = vsel %vm159_vm5, 1.0, %v424_v21  ;;  %v326_v25 = vsel %vm160_vm6, 1.0, %v424_v21 }
  0x12   :  { %349 = vmatprep.mubr.msk.f32.mxu1 %vm170_vm2, %v325_v24 }
  0x15   :  { %350 = vmatmul.mubr.msk.f32.gmra.mxu1 %vm170_vm2, %v326_v25 }
  0xc6   :  { %v343_v26 = vpop.f32.mrf.mxu0 }
  0xc7   :  { %113 = vst.msk [vmem:[#allocation2 + $0x8] sm:$0xff] %vm111_vm7, %v343_v26 }
  0xc8   :  { %v102_v27 = vpop.f32.mrf.mxu0 }
  0xc9   :  { %112 = vst.msk [vmem:[#allocation2] sm:$0xff] %vm111_vm7, %v102_v27 }
  0xca   :  { %370 = shalt.err (!%p367_p4)
}
  0xcb   :  { %s426_s30 = smov 128   ;;  %s427_s7 = smov 8  }
  0xcc   :  { %283 = dma.vmem_to_hbm [thread:$0]  %s278_s1, 256, %s508_s4, [#allocation3], %s426_s30, %s426_s30, %s427_s7  }
  0xcd   :  { %s428_s10 = smov [#allocation4]   ;;  %s429_s12 = smov [#allocation6]  }
  0xce   :  { %s289_s11 = sshll.u32 %s428_s10, 4  ;;  %s301_s13 = sshll.u32 %s429_s12, 4  ;;  %s290_s11 = int_to_ptr.vmem [resolvable:$true] %s289_s11  ;;  %s302_s13 = int_to_ptr.vmem [resolvable:$true] %s301_s13 }
  0xcf   :  { %s379_s14 = scalar_lea.vmem %s290_s11, 256  ;;  %p384_p6 = scmp.lt.s32.totalorder %s290_s11, %s290_s11 }
  0xd0   :  { %p380_p5 = scmp.ne.s32.totalorder %s290_s11, %s379_s14  ;;  %p385_p7 = scmp.lt.s32.totalorder %s379_s14, %s379_s14 }
  0xd1   :  { %v348_v28 = vpop.f32.mrf.mxu1 }
  0xd2   :  { %269 = vst.msk [vmem:[#allocation4 + $0x8] sm:$0xff] %vm111_vm7, %v348_v28  ;;  %p386_p8 = por %p385_p7, %p384_p6 }
  0xd3   :  { %v249_v29 = vpop.f32.mrf.mxu1 }
  0xd4   :  { %268 = vst.msk [vmem:[#allocation4] sm:$0xff] %vm111_vm7, %v249_v29  ;;  %p387_p9 = pnand %p386_p8, %p380_p5 }
  0xd5   :  { %v351_v30 = vpop.f32.mrf.mxu1 }
  0xd6   :  { %390 = shalt.err (!%p387_p9)
}
  0xd7   :  { %295 = dma.vmem_to_hbm [thread:$0]  %s290_s11, 256, %s509_s5, [#allocation5], %s426_s30, %s426_s30, %s427_s7   ;;  %271 = vst.msk [vmem:[#allocation6 + $0x8] sm:$0xff] %vm111_vm7, %v351_v30  ;;  %v259_v31 = vpop.f32.mrf.mxu1 }
  0xd8   :  { %270 = vst.msk [vmem:[#allocation6] sm:$0xff] %vm111_vm7, %v259_v31  ;;  %s399_s16 = scalar_lea.vmem %s302_s13, 256  ;;  %p404_p11 = scmp.lt.s32.totalorder %s302_s13, %s302_s13 }
  0xd9   :  { %p400_p10 = scmp.ne.s32.totalorder %s302_s13, %s399_s16  ;;  %p405_p12 = scmp.lt.s32.totalorder %s399_s16, %s399_s16 }
  0xdb   :  { %p406_p13 = por %p405_p12, %p404_p11 }
  0xdd   :  { %p407_p0 = pnand %p406_p13, %p400_p10 }
  0xdf   :  { %410 = shalt.err (!%p407_p0)
}
  0xe0   :  { %307 = dma.vmem_to_hbm [thread:$0]  %s302_s13, 256, %s510_s6, [#allocation5], %s426_s30, %s426_s30, %s427_s7  }
  0xe1   :  { %419 = dma.done.wait [#allocation3], 256  }
  0xe2   :  { %420 = vsyncadd [#allocation3], 4294967040 }
  0xe3   :  { %421 = dma.done.wait [#allocation5], 512  }
  0xe4   :  { %422 = vsyncadd [#allocation5], 4294966784 }
  0xe5   :  { %317 = vsyncpa [#allocation3], 1 }
  0xe6   :  { %318 = vsyncpa [#allocation5], 1 }

</bundles_post_ra>
